<compile_context>
chip_gen: v7x
topology: tpu7x:2x2x1
jax: 0.10.0
libtpu: 0.0.40
codegen_flags: <defaults>
</compile_context>

<pallas_src>
import functools
import math

import jax
import jax.numpy as jnp
from jax import lax
from jax.experimental import pallas as pl
from jax.experimental.pallas import tpu as pltpu


def autoencoder_kernel(x_ref,
                       w1_ref, b1_ref, w2_ref, b2_ref, w3_ref, b3_ref,
                       w4_ref, b4_ref, w5_ref, b5_ref, w6_ref, b6_ref,
                       out_ref, *, compute_dtype):
    """Full encoder+decoder MLP on one (batch_tile, in_size) tile, all in VMEM.

    Internal layout is (features, batch_tile): batch on lanes, features on sublanes.
    y = W @ h + b  with W in native PyTorch (out, in) layout and b as an (out, 1) column
    reproduces nn.Linear exactly in this layout.
    """
    x = x_ref[...]                                          # (bt, in_size) fp32, native

    # Layer 1: fuse the batch->lane swap into the matmul by contracting the feature dim
    # of both operands ("ok,bk->ob").  Result (out1, bt), fp32 accumulation on the MXU.
    h = lax.dot_general(
        w1_ref[...], x.astype(compute_dtype),
        dimension_numbers=(((1,), (1,)), ((), ())),
        preferred_element_type=jnp.float32)
    h = jnp.maximum(h + b1_ref[...], 0.0)                   # bias add + ReLU in fp32

    # Layers 2..6: plain (out, in) @ (in, bt) matmuls, batch stays on lanes.
    for w_ref, b_ref in ((w2_ref, b2_ref), (w3_ref, b3_ref), (w4_ref, b4_ref),
                         (w5_ref, b5_ref), (w6_ref, b6_ref)):
        y = jnp.dot(w_ref[...], h.astype(compute_dtype),
                    preferred_element_type=jnp.float32)
        h = jnp.maximum(y + b_ref[...], 0.0)                # (out, bt) fp32

    # Module ends with sigmoid(relu(deconv3(z))).  h >= 0 here so exp(-h) <= 1 and the
    # exact closed form is numerically safe (no approx reciprocal -> bit-closer to ref).
    s = 1.0 / (1.0 + jnp.exp(-h))                           # (in_size, bt) fp32

    # Single in-kernel transpose back to the native (batch, feature) layout.  The
    # operand is (in_size, bt) with in_size % 8 == 0 and bt % 128 == 0, so this is a
    # clean XLU transpose; the 64-lane output store is masked but costs only a few
    # extra store cycles per tile.
    out_ref[...] = s.T.astype(out_ref.dtype)


def _auto_batch_tile(B):
    """~B/4, rounded to a multiple of 256 (full-width MXU N passes), in [256, 2048]."""
    return max(256, min(2048, 256 * max(1, (B // 4) // 256)))


def c_autoencoder_forward(x, params, *, batch_tile=None, use_bf16=True):
    """x: (B, in_size) float32.  params: list of 6 (W_(out,in), b_(out,1)) fp32 pairs."""
    B, in_size = x.shape
    if batch_tile is None:
        batch_tile = _auto_batch_tile(B)
    assert batch_tile % 8 == 0, "batch_tile must be a multiple of 8"
    n_tiles = pl.cdiv(B, batch_tile)

    compute_dtype = jnp.bfloat16 if use_bf16 else jnp.float32

    # Native-layout activation tiles: batch on the (blocked) sublane axis in HBM.
    x_spec = pl.BlockSpec((batch_tile, in_size), lambda i: (i, 0))
    out_spec = pl.BlockSpec((batch_tile, in_size), lambda i: (i, 0))

    # Weights/biases: whole-array blocks with a constant index_map -> DMA'd once and
    # kept resident in VMEM across all grid steps.  W pre-cast to the compute dtype
    # here (once), so no per-step casts of constant data inside the kernel.
    param_specs, flat_params = [], []
    for (w, b) in params:
        param_specs.append(pl.BlockSpec(w.shape, lambda i: (0, 0)))
        param_specs.append(pl.BlockSpec(b.shape, lambda i: (0, 0)))
        flat_params.extend([w.astype(compute_dtype), b])

    fn = pl.pallas_call(
        functools.partial(autoencoder_kernel, compute_dtype=compute_dtype),
        out_shape=jax.ShapeDtypeStruct((B, in_size), x.dtype),
        grid=(n_tiles,),
        in_specs=[x_spec] + param_specs,
        out_specs=out_spec,
        compiler_params=pltpu.CompilerParams(
            dimension_semantics=("parallel",),
            # Double-buffered fp32 (batch_tile, in_size) in/out tiles + resident
            # weights stay well under 32 MiB at these sizes; 32 MiB is safe on
            # v5e/v6e (scoped defaults 16/32 MiB) and under the v7x 64 MiB cap.
            vmem_limit_bytes=32 * 1024 * 1024,
        ),
    )
    return fn(x, *flat_params)                              # (B, in_size), native layout


def init_params(in_size, key):
    """Deterministic init matching the 6 nn.Linear layers of C_AutoEncoder.

    W stored in native PyTorch layout (fan_out, fan_in); b as (fan_out, 1).
    Both drawn from U(-1/sqrt(fan_in), 1/sqrt(fan_in)) like PyTorch's default.
    """
    assert in_size % 8 == 0, "in_size must be divisible by 8 (bottleneck is in_size/8)"
    dims = [in_size, in_size // 2, in_size // 4, in_size // 8,
            in_size // 4, in_size // 2, in_size]
    params = []
    for li in range(6):
        fan_in, fan_out = dims[li], dims[li + 1]
        key, kw, kb = jax.random.split(key, 3)
        bound = 1.0 / math.sqrt(fan_in)
        w = jax.random.uniform(kw, (fan_out, fan_in), jnp.float32, -bound, bound)
        b = jax.random.uniform(kb, (fan_out, 1), jnp.float32, -bound, bound)
        params.append((w, b))
    return params


def reference_forward(x, params, *, use_bf16=False):
    """Pure-JAX reference with the module's semantics: ReLU after every Linear,
    sigmoid(relu(.)) at the end.  use_bf16=True mirrors the kernel's matmul numerics."""
    h = x
    for (w, b) in params:
        if use_bf16:
            y = jnp.dot(h.astype(jnp.bfloat16), w.astype(jnp.bfloat16).T,
                        preferred_element_type=jnp.float32)
        else:
            y = h @ w.T
        h = jnp.maximum(y + b.reshape(1, -1), 0.0)
    return 1.0 / (1.0 + jnp.exp(-h))


if __name__ == "__main__":
    in_size = 64        # must be divisible by 8 (the int(in_size/8) bottleneck layer)
    batch = 1024        # auto batch_tile = 256 -> 4 grid steps (even split on v7x TCs)

    key = jax.random.PRNGKey(0)
    kx, kp = jax.random.split(key)
    x = jax.random.uniform(kx, (batch, in_size), jnp.float32)
    params = init_params(in_size, kp)

    fwd = jax.jit(c_autoencoder_forward, static_argnames=("batch_tile", "use_bf16"))

    out = jax.block_until_ready(fwd(x, params))
    assert out.shape == (batch, in_size)

    # Tight check vs a reference with matching numerics (bf16 matmul operands, fp32 acc).
    ref_bf16 = reference_forward(x, params, use_bf16=True)
    assert jnp.allclose(out, ref_bf16, atol=5e-3, rtol=0.0), "mismatch vs bf16-matched reference"

    # Sanity check vs the exact fp32 PyTorch-semantics reference.
    ref_f32 = reference_forward(x, params, use_bf16=False)
    assert jnp.allclose(out, ref_f32, atol=5e-2, rtol=0.0), "mismatch vs fp32 reference"

    # Exercise the ragged-batch path (B not a multiple of batch_tile): the last grid
    # block is partial and its store is masked in-kernel -- no host-side pad/slice.
    out_odd = jax.block_until_ready(fwd(x[:300], params))
    assert out_odd.shape == (300, in_size)
    assert jnp.allclose(out_odd, ref_bf16[:300], atol=5e-3, rtol=0.0), "mismatch on ragged batch"

    print("KERNEL_OK")
</pallas_src>

<mosaic_0001>
module attributes {stable_mosaic.version = 11 : i64} {
  func.func @autoencoder_kernel(%arg0: i32, %arg1: memref<256x64xf32, #tpu.memory_space<vmem>>, %arg2: memref<32x64xbf16, #tpu.memory_space<vmem>>, %arg3: memref<32x1xf32, #tpu.memory_space<vmem>>, %arg4: memref<16x32xbf16, #tpu.memory_space<vmem>>, %arg5: memref<16x1xf32, #tpu.memory_space<vmem>>, %arg6: memref<8x16xbf16, #tpu.memory_space<vmem>>, %arg7: memref<8x1xf32, #tpu.memory_space<vmem>>, %arg8: memref<16x8xbf16, #tpu.memory_space<vmem>>, %arg9: memref<16x1xf32, #tpu.memory_space<vmem>>, %arg10: memref<32x16xbf16, #tpu.memory_space<vmem>>, %arg11: memref<32x1xf32, #tpu.memory_space<vmem>>, %arg12: memref<64x32xbf16, #tpu.memory_space<vmem>>, %arg13: memref<64x1xf32, #tpu.memory_space<vmem>>, %arg14: memref<256x64xf32, #tpu.memory_space<vmem>>) attributes {dimension_semantics = [#tpu.dimension_semantics<parallel>], iteration_bounds = array<i64: 4>, scalar_prefetch = 0 : i64, scratch_operands = 0 : i64, tpu.core_type = #tpu.core_type<tc>, window_params = [{transform_indices = @transform_0, window_bounds = array<i64: 256, 64>}, {pipeline_mode = #tpu.pipeline_mode<synchronous>, transform_indices = @transform_1, window_bounds = array<i64: 32, 64>}, {pipeline_mode = #tpu.pipeline_mode<synchronous>, transform_indices = @transform_2, window_bounds = array<i64: 32, 1>}, {pipeline_mode = #tpu.pipeline_mode<synchronous>, transform_indices = @transform_3, window_bounds = array<i64: 16, 32>}, {pipeline_mode = #tpu.pipeline_mode<synchronous>, transform_indices = @transform_4, window_bounds = array<i64: 16, 1>}, {pipeline_mode = #tpu.pipeline_mode<synchronous>, transform_indices = @transform_5, window_bounds = array<i64: 8, 16>}, {pipeline_mode = #tpu.pipeline_mode<synchronous>, transform_indices = @transform_6, window_bounds = array<i64: 8, 1>}, {pipeline_mode = #tpu.pipeline_mode<synchronous>, transform_indices = @transform_7, window_bounds = array<i64: 16, 8>}, {pipeline_mode = #tpu.pipeline_mode<synchronous>, transform_indices = @transform_8, window_bounds = array<i64: 16, 1>}, {pipeline_mode = #tpu.pipeline_mode<synchronous>, transform_indices = @transform_9, window_bounds = array<i64: 32, 16>}, {pipeline_mode = #tpu.pipeline_mode<synchronous>, transform_indices = @transform_10, window_bounds = array<i64: 32, 1>}, {pipeline_mode = #tpu.pipeline_mode<synchronous>, transform_indices = @transform_11, window_bounds = array<i64: 64, 32>}, {pipeline_mode = #tpu.pipeline_mode<synchronous>, transform_indices = @transform_12, window_bounds = array<i64: 64, 1>}, {transform_indices = @transform_13, window_bounds = array<i64: 256, 64>}]} {
    %c0 = arith.constant 0 : index
    %c0_0 = arith.constant 0 : index
    %0 = vector.load %arg1[%c0, %c0_0] : memref<256x64xf32, #tpu.memory_space<vmem>>, vector<256x64xf32>
    %c0_1 = arith.constant 0 : index
    %c0_2 = arith.constant 0 : index
    %1 = vector.load %arg2[%c0_1, %c0_2] : memref<32x64xbf16, #tpu.memory_space<vmem>>, vector<32x64xbf16>
    %2 = arith.truncf %0 : vector<256x64xf32> to vector<256x64xbf16>
    %cst = arith.constant dense<0.000000e+00> : vector<32x256xf32>
    %3 = tpu.matmul %1, %2, %cst {dimension_numbers = #tpu.dot_dimension_numbers<[1], [1], [0], [0], [0, 0, 1, 0], [], []>} : vector<32x64xbf16>, vector<256x64xbf16>, vector<32x256xf32> -> vector<32x256xf32>
    %c0_3 = arith.constant 0 : index
    %c0_4 = arith.constant 0 : index
    %4 = vector.load %arg3[%c0_3, %c0_4] : memref<32x1xf32, #tpu.memory_space<vmem>>, vector<32x1xf32>
    %5 = vector.broadcast %4 : vector<32x1xf32> to vector<32x256xf32>
    %6 = arith.addf %3, %5 : vector<32x256xf32>
    %cst_5 = arith.constant 0.000000e+00 : f32
    %7 = vector.broadcast %cst_5 : f32 to vector<32x256xf32>
    %8 = arith.maximumf %6, %7 : vector<32x256xf32>
    %c0_6 = arith.constant 0 : index
    %c0_7 = arith.constant 0 : index
    %9 = vector.load %arg4[%c0_6, %c0_7] : memref<16x32xbf16, #tpu.memory_space<vmem>>, vector<16x32xbf16>
    %10 = arith.truncf %8 : vector<32x256xf32> to vector<32x256xbf16>
    %cst_8 = arith.constant dense<0.000000e+00> : vector<16x256xf32>
    %11 = tpu.matmul %9, %10, %cst_8 {dimension_numbers = #tpu.dot_dimension_numbers<[1], [0], [0], [1], [0, 0, 1, 1], [], []>} : vector<16x32xbf16>, vector<32x256xbf16>, vector<16x256xf32> -> vector<16x256xf32>
    %c0_9 = arith.constant 0 : index
    %c0_10 = arith.constant 0 : index
    %12 = vector.load %arg5[%c0_9, %c0_10] : memref<16x1xf32, #tpu.memory_space<vmem>>, vector<16x1xf32>
    %13 = vector.broadcast %12 : vector<16x1xf32> to vector<16x256xf32>
    %14 = arith.addf %11, %13 : vector<16x256xf32>
    %cst_11 = arith.constant 0.000000e+00 : f32
    %15 = vector.broadcast %cst_11 : f32 to vector<16x256xf32>
    %16 = arith.maximumf %14, %15 : vector<16x256xf32>
    %c0_12 = arith.constant 0 : index
    %c0_13 = arith.constant 0 : index
    %17 = vector.load %arg6[%c0_12, %c0_13] : memref<8x16xbf16, #tpu.memory_space<vmem>>, vector<8x16xbf16>
    %18 = arith.truncf %16 : vector<16x256xf32> to vector<16x256xbf16>
    %cst_14 = arith.constant dense<0.000000e+00> : vector<8x256xf32>
    %19 = tpu.matmul %17, %18, %cst_14 {dimension_numbers = #tpu.dot_dimension_numbers<[1], [0], [0], [1], [0, 0, 1, 1], [], []>} : vector<8x16xbf16>, vector<16x256xbf16>, vector<8x256xf32> -> vector<8x256xf32>
    %c0_15 = arith.constant 0 : index
    %c0_16 = arith.constant 0 : index
    %20 = vector.load %arg7[%c0_15, %c0_16] : memref<8x1xf32, #tpu.memory_space<vmem>>, vector<8x1xf32>
    %21 = vector.broadcast %20 : vector<8x1xf32> to vector<8x256xf32>
    %22 = arith.addf %19, %21 : vector<8x256xf32>
    %cst_17 = arith.constant 0.000000e+00 : f32
    %23 = vector.broadcast %cst_17 : f32 to vector<8x256xf32>
    %24 = arith.maximumf %22, %23 : vector<8x256xf32>
    %c0_18 = arith.constant 0 : index
    %c0_19 = arith.constant 0 : index
    %25 = vector.load %arg8[%c0_18, %c0_19] : memref<16x8xbf16, #tpu.memory_space<vmem>>, vector<16x8xbf16>
    %26 = arith.truncf %24 : vector<8x256xf32> to vector<8x256xbf16>
    %cst_20 = arith.constant dense<0.000000e+00> : vector<16x256xf32>
    %27 = tpu.matmul %25, %26, %cst_20 {dimension_numbers = #tpu.dot_dimension_numbers<[1], [0], [0], [1], [0, 0, 1, 1], [], []>} : vector<16x8xbf16>, vector<8x256xbf16>, vector<16x256xf32> -> vector<16x256xf32>
    %c0_21 = arith.constant 0 : index
    %c0_22 = arith.constant 0 : index
    %28 = vector.load %arg9[%c0_21, %c0_22] : memref<16x1xf32, #tpu.memory_space<vmem>>, vector<16x1xf32>
    %29 = vector.broadcast %28 : vector<16x1xf32> to vector<16x256xf32>
    %30 = arith.addf %27, %29 : vector<16x256xf32>
    %cst_23 = arith.constant 0.000000e+00 : f32
    %31 = vector.broadcast %cst_23 : f32 to vector<16x256xf32>
    %32 = arith.maximumf %30, %31 : vector<16x256xf32>
    %c0_24 = arith.constant 0 : index
    %c0_25 = arith.constant 0 : index
    %33 = vector.load %arg10[%c0_24, %c0_25] : memref<32x16xbf16, #tpu.memory_space<vmem>>, vector<32x16xbf16>
    %34 = arith.truncf %32 : vector<16x256xf32> to vector<16x256xbf16>
    %cst_26 = arith.constant dense<0.000000e+00> : vector<32x256xf32>
    %35 = tpu.matmul %33, %34, %cst_26 {dimension_numbers = #tpu.dot_dimension_numbers<[1], [0], [0], [1], [0, 0, 1, 1], [], []>} : vector<32x16xbf16>, vector<16x256xbf16>, vector<32x256xf32> -> vector<32x256xf32>
    %c0_27 = arith.constant 0 : index
    %c0_28 = arith.constant 0 : index
    %36 = vector.load %arg11[%c0_27, %c0_28] : memref<32x1xf32, #tpu.memory_space<vmem>>, vector<32x1xf32>
    %37 = vector.broadcast %36 : vector<32x1xf32> to vector<32x256xf32>
    %38 = arith.addf %35, %37 : vector<32x256xf32>
    %cst_29 = arith.constant 0.000000e+00 : f32
    %39 = vector.broadcast %cst_29 : f32 to vector<32x256xf32>
    %40 = arith.maximumf %38, %39 : vector<32x256xf32>
    %c0_30 = arith.constant 0 : index
    %c0_31 = arith.constant 0 : index
    %41 = vector.load %arg12[%c0_30, %c0_31] : memref<64x32xbf16, #tpu.memory_space<vmem>>, vector<64x32xbf16>
    %42 = arith.truncf %40 : vector<32x256xf32> to vector<32x256xbf16>
    %cst_32 = arith.constant dense<0.000000e+00> : vector<64x256xf32>
    %43 = tpu.matmul %41, %42, %cst_32 {dimension_numbers = #tpu.dot_dimension_numbers<[1], [0], [0], [1], [0, 0, 1, 1], [], []>} : vector<64x32xbf16>, vector<32x256xbf16>, vector<64x256xf32> -> vector<64x256xf32>
    %c0_33 = arith.constant 0 : index
    %c0_34 = arith.constant 0 : index
    %44 = vector.load %arg13[%c0_33, %c0_34] : memref<64x1xf32, #tpu.memory_space<vmem>>, vector<64x1xf32>
    %45 = vector.broadcast %44 : vector<64x1xf32> to vector<64x256xf32>
    %46 = arith.addf %43, %45 : vector<64x256xf32>
    %cst_35 = arith.constant 0.000000e+00 : f32
    %47 = vector.broadcast %cst_35 : f32 to vector<64x256xf32>
    %48 = arith.maximumf %46, %47 : vector<64x256xf32>
    %cst_36 = arith.constant 0.000000e+00 : f32
    %49 = vector.broadcast %cst_36 : f32 to vector<64x256xf32>
    %50 = arith.subf %49, %48 : vector<64x256xf32>
    %51 = math.exp %50 : vector<64x256xf32>
    %cst_37 = arith.constant 1.000000e+00 : f32
    %52 = vector.broadcast %cst_37 : f32 to vector<64x256xf32>
    %53 = arith.addf %52, %51 : vector<64x256xf32>
    %cst_38 = arith.constant 1.000000e+00 : f32
    %54 = vector.broadcast %cst_38 : f32 to vector<64x256xf32>
    %55 = arith.divf %54, %53 : vector<64x256xf32>
    %56 = tpu.transpose %55, [1, 0] : vector<64x256xf32> -> vector<256x64xf32>
    %c0_39 = arith.constant 0 : index
    %c0_40 = arith.constant 0 : index
    %57 = vector.load %arg14[%c0_39, %c0_40] : memref<256x64xf32, #tpu.memory_space<vmem>>, vector<256x64xf32>
    tpu.vector_store %arg14[%c0_39, %c0_40], %56 {strides = array<i32>} : memref<256x64xf32, #tpu.memory_space<vmem>>, vector<256x64xf32>,
    return
  }
  func.func @transform_0(%arg0: i32) -> (i32, i32) {
    %c0_i32 = arith.constant 0 : i32
    %c0_i32_0 = arith.constant 0 : i32
    return %arg0, %c0_i32 : i32, i32
  }
  func.func @transform_1(%arg0: i32) -> (i32, i32) {
    %c0_i32 = arith.constant 0 : i32
    %c0_i32_0 = arith.constant 0 : i32
    %c0_i32_1 = arith.constant 0 : i32
    return %c0_i32, %c0_i32_0 : i32, i32
  }
  func.func @transform_2(%arg0: i32) -> (i32, i32) {
    %c0_i32 = arith.constant 0 : i32
    %c0_i32_0 = arith.constant 0 : i32
    %c0_i32_1 = arith.constant 0 : i32
    return %c0_i32, %c0_i32_0 : i32, i32
  }
  func.func @transform_3(%arg0: i32) -> (i32, i32) {
    %c0_i32 = arith.constant 0 : i32
    %c0_i32_0 = arith.constant 0 : i32
    %c0_i32_1 = arith.constant 0 : i32
    return %c0_i32, %c0_i32_0 : i32, i32
  }
  func.func @transform_4(%arg0: i32) -> (i32, i32) {
    %c0_i32 = arith.constant 0 : i32
    %c0_i32_0 = arith.constant 0 : i32
    %c0_i32_1 = arith.constant 0 : i32
    return %c0_i32, %c0_i32_0 : i32, i32
  }
  func.func @transform_5(%arg0: i32) -> (i32, i32) {
    %c0_i32 = arith.constant 0 : i32
    %c0_i32_0 = arith.constant 0 : i32
    %c0_i32_1 = arith.constant 0 : i32
    return %c0_i32, %c0_i32_0 : i32, i32
  }
  func.func @transform_6(%arg0: i32) -> (i32, i32) {
    %c0_i32 = arith.constant 0 : i32
    %c0_i32_0 = arith.constant 0 : i32
    %c0_i32_1 = arith.constant 0 : i32
    return %c0_i32, %c0_i32_0 : i32, i32
  }
  func.func @transform_7(%arg0: i32) -> (i32, i32) {
    %c0_i32 = arith.constant 0 : i32
    %c0_i32_0 = arith.constant 0 : i32
    %c0_i32_1 = arith.constant 0 : i32
    return %c0_i32, %c0_i32_0 : i32, i32
  }
  func.func @transform_8(%arg0: i32) -> (i32, i32) {
    %c0_i32 = arith.constant 0 : i32
    %c0_i32_0 = arith.constant 0 : i32
    %c0_i32_1 = arith.constant 0 : i32
    return %c0_i32, %c0_i32_0 : i32, i32
  }
  func.func @transform_9(%arg0: i32) -> (i32, i32) {
    %c0_i32 = arith.constant 0 : i32
    %c0_i32_0 = arith.constant 0 : i32
    %c0_i32_1 = arith.constant 0 : i32
    return %c0_i32, %c0_i32_0 : i32, i32
  }
  func.func @transform_10(%arg0: i32) -> (i32, i32) {
    %c0_i32 = arith.constant 0 : i32
    %c0_i32_0 = arith.constant 0 : i32
    %c0_i32_1 = arith.constant 0 : i32
    return %c0_i32, %c0_i32_0 : i32, i32
  }
  func.func @transform_11(%arg0: i32) -> (i32, i32) {
    %c0_i32 = arith.constant 0 : i32
    %c0_i32_0 = arith.constant 0 : i32
    %c0_i32_1 = arith.constant 0 : i32
    return %c0_i32, %c0_i32_0 : i32, i32
  }
  func.func @transform_12(%arg0: i32) -> (i32, i32) {
    %c0_i32 = arith.constant 0 : i32
    %c0_i32_0 = arith.constant 0 : i32
    %c0_i32_1 = arith.constant 0 : i32
    return %c0_i32, %c0_i32_0 : i32, i32
  }
  func.func @transform_13(%arg0: i32) -> (i32, i32) {
    %c0_i32 = arith.constant 0 : i32
    %c0_i32_0 = arith.constant 0 : i32
    return %arg0, %c0_i32 : i32, i32
  }
}

</mosaic_0001>

<bundles_post_ra>
// kernel: c_autoencoder_forward.1
= control target key start
LH: loop header
LB: loop body
LE: loop exit
PB: predicated region body
PF: predicated region fallthrough
CT: control target
= control target key end

     0   :  { %s1618_s25 = smov 0   ;;  %s1881_s0 = inlined_call_operand.vmem [shape: f32[1024,64], index: 0, kind: input, shape index: {}]   ;;  %s1882_s1 = inlined_call_operand.vmem [shape: bf16[32,64], index: 1, kind: input, shape index: {}]   ;;  %s1883_s2 = inlined_call_operand.vmem [shape: f32[32,1], index: 2, kind: input, shape index: {}]   ;;  %s1884_s3 = inlined_call_operand.vmem [shape: bf16[16,32], index: 3, kind: input, shape index: {}]   ;;  %s1885_s4 = inlined_call_operand.vmem [shape: f32[16,1], index: 4, kind: input, shape index: {}]   ;;  %s1886_s5 = inlined_call_operand.vmem [shape: bf16[8,16], index: 5, kind: input, shape index: {}]   ;;  %s1887_s6 = inlined_call_operand.vmem [shape: f32[8,1], index: 6, kind: input, shape index: {}]   ;;  %s1888_s7 = inlined_call_operand.vmem [shape: bf16[16,8], index: 7, kind: input, shape index: {}]   ;;  %s1889_s8 = inlined_call_operand.vmem [shape: f32[16,1], index: 8, kind: input, shape index: {}]   ;;  %s1890_s9 = inlined_call_operand.vmem [shape: bf16[32,16], index: 9, kind: input, shape index: {}]   ;;  %s1891_s10 = inlined_call_operand.vmem [shape: f32[32,1], index: 10, kind: input, shape index: {}]   ;;  %s1892_s11 = inlined_call_operand.vmem [shape: bf16[64,32], index: 11, kind: input, shape index: {}]   ;;  %s1893_s12 = inlined_call_operand.vmem [shape: f32[64,1], index: 12, kind: input, shape index: {}]   ;;  %s1894_s13 = inlined_call_operand.vmem [shape: f32[1024,64], index: 13, kind: output, shape index: {}]  }
   0x1 LB: > { %s1392_s26 = sadd.s32 4294967295, %s1545_s25   ;;  %p1396_p0 = scmp.ge.s32.totalorder %s1545_s25, 1  ;;  %s1545_s25 = sphi %s1618_s25, %s23_s25  }
   0x2   : > { %p388_p1 = scmp.lt.s32.totalorder %s1545_s25, 5 }
   0x4   : > { %p389_p2 = pnand %p1396_p0, %p388_p1 }
   0x5   : > { %s1397_s27 = sshll.u32 (!%p389_p2), %s1392_s26, 5  ;;  %v1629_v0 = vld [vmem:[%s1882_s1] sm:$0xff] (!%p389_p2)   ;;  %vm531_vm0 = vcmask (!%p389_p2), 523264   ;;  %v1547_v2 = vmov (!%p389_p2), 0   ;;  %v499_v3 = vld [vmem:[%s1883_s2 + $0x10] sm:$0xff] (!%p389_p2)  ;;  %v498_v4 = vld [vmem:[%s1883_s2 + $0x8] sm:$0xff] (!%p389_p2) }
   0x6   : > { %392 = sbr.rel (%p389_p2) target bundleno = 1659 (0x67b), region = 72  ;;  %p433_p3 = scmp.lt.s32.totalorder (!%p389_p2), %s1397_s27, 127  ;;  %v497_v1 = vld [vmem:[%s1883_s2] sm:$0xff] (!%p389_p2)  ;;  %1441 = vmatprep.mubr.msk.bf16.mxu0 (!%p389_p2), %vm531_vm0, %v1629_v0  ;;  %1463 = vset.pattern.permute.xlu0 (!%p389_p2), %v1547_v2  ;;  %v500_v5 = vld [vmem:[%s1883_s2 + $0x18] sm:$0xff] (!%p389_p2)  ;;  %v654_v18 = vld [vmem:[%s1885_s4 + $0x8] sm:$0xff] (!%p389_p2)  ;;  %vm670_vm1 = vcmask (!%p389_p2), 261120  }
   0x7   : > { %503 = vperm.xlu0 (!%p389_p2), %1463, %v497_v1   ;;  %1464 = vset.pattern.permute.xlu1 (!%p389_p2), %v1547_v2  ;;  %v653_v15 = vld [vmem:[%s1885_s4] sm:$0xff] (!%p389_p2)  ;;  %v782_v27 = vld [vmem:[%s1889_s8 + $0x8] sm:$0xff] (!%p389_p2)  ;;  %v864_v34 = vld [vmem:[%s1891_s10 + $0x10] sm:$0xff] (!%p389_p2)  ;;  %vm730_vm2 = vcmask (!%p389_p2), 130048   ;;  %vm802_vm3 = vcmask (!%p389_p2), 1043456   ;;  %vm798_vm4 = vcmask (!%p389_p2), 64512  }
   0x8   : > { %513 = vperm.xlu1 (!%p389_p2), %1464, %v499_v3   ;;  %706 = vmatprep.mubr.bf16.mxu1 (!%p389_p2), %v1547_v2  ;;  %v724_v21 = vld [vmem:[%s1887_s6] sm:$0xff] (!%p389_p2)  ;;  %v863_v31 = vld [vmem:[%s1891_s10 + $0x8] sm:$0xff] (!%p389_p2)  ;;  %v865_v38 = vld [vmem:[%s1891_s10 + $0x18] sm:$0xff] (!%p389_p2) }
   0x9   : > { %v781_v24 = vld [vmem:[%s1889_s8] sm:$0xff] (!%p389_p2)  ;;  %v976_v43 = vld [vmem:[%s1893_s12 + $0x8] sm:$0xff] (!%p389_p2)  ;;  %v977_v46 = vld [vmem:[%s1893_s12 + $0x10] sm:$0xff] (!%p389_p2) }
   0xa   : > { %v862_v30 = vld [vmem:[%s1891_s10] sm:$0xff] (!%p389_p2)  ;;  %v978_v49 = vld [vmem:[%s1893_s12 + $0x18] sm:$0xff] (!%p389_p2)  ;;  %v980_v54 = vld [vmem:[%s1893_s12 + $0x28] sm:$0xff] (!%p389_p2) }
   0xb   : > { %508 = vperm.xlu0 (!%p389_p2), %1463, %v498_v4   ;;  %v975_v41 = vld [vmem:[%s1893_s12] sm:$0xff] (!%p389_p2)  ;;  %v981_v57 = vld [vmem:[%s1893_s12 + $0x30] sm:$0xff] (!%p389_p2)  ;;  %v982_v60 = vld [vmem:[%s1893_s12 + $0x38] sm:$0xff] (!%p389_p2) }
   0xc   : > { %518 = vperm.xlu1 (!%p389_p2), %1464, %v500_v5   ;;  %v979_v52 = vld [vmem:[%s1893_s12 + $0x20] sm:$0xff] (!%p389_p2) }
   0xd   : > { %s1896_s27 = smov (!%p433_p3, %s1397_s27), 127 }
   0xe   : > { %s1398_s17 = sshll.u32 %s1896_s27, 3 }
   0xf   : > { %s1653_s22 = scalar_lea.vmem %s1881_s0, %s1398_s17  ;;  %657 = vperm.xlu0 %1463, %v653_v15   ;;  %s1812_s29 = scalar_lea.vmem %s1894_s13, %s1398_s17 }
  0x10   : > { %v461_v6 = vld [vmem:[%s1653_s22 + $0x80] sm:$0xff]  ;;  %v462_v7 = vld [vmem:[%s1653_s22 + $0x88] sm:$0xff]  ;;  %v463_v11 = vld [vmem:[%s1653_s22 + $0x90] sm:$0xff]  ;;  %662 = vperm.xlu1 %1464, %v654_v18  }
  0x11   : > { %v445_v8 = vld [vmem:[%s1653_s22] sm:$0xff]  ;;  %v489_v9 = vpack.c.bf16 %v462_v7, %v461_v6  ;;  %v446_v10 = vld [vmem:[%s1653_s22 + $0x8] sm:$0xff]  ;;  %v464_v12 = vld [vmem:[%s1653_s22 + $0x98] sm:$0xff] }
  0x12   : > { %v481_v13 = vpack.c.bf16 %v446_v10, %v445_v8  ;;  %v490_v14 = vpack.c.bf16 %v464_v12, %v463_v11  ;;  %v447_v16 = vld [vmem:[%s1653_s22 + $0x10] sm:$0xff]  ;;  %v448_v17 = vld [vmem:[%s1653_s22 + $0x18] sm:$0xff]  ;;  %v465_v22 = vld [vmem:[%s1653_s22 + $0xa0] sm:$0xff] }
  0x13   : > { %1445 = vmatprep.subr.msk.bf16.mxu0 %vm531_vm0, %v489_v9  ;;  %v482_v20 = vpack.c.bf16 %v448_v17, %v447_v16  ;;  %v466_v23 = vld [vmem:[%s1653_s22 + $0xa8] sm:$0xff]  ;;  %727 = vperm.xlu0 %1463, %v724_v21   ;;  %v449_v28 = vld [vmem:[%s1653_s22 + $0x20] sm:$0xff]  ;;  %v467_v32 = vld [vmem:[%s1653_s22 + $0xb0] sm:$0xff] }
  0x14   : > { %v539_v19 = vsel %vm531_vm0, %v481_v13, 0  ;;  %v491_v26 = vpack.c.bf16 %v466_v23, %v465_v22  ;;  %785 = vperm.xlu1 %1464, %v781_v24   ;;  %v450_v29 = vld [vmem:[%s1653_s22 + $0x28] sm:$0xff]  ;;  %v468_v33 = vld [vmem:[%s1653_s22 + $0xb8] sm:$0xff]  ;;  %v451_v39 = vld [vmem:[%s1653_s22 + $0x30] sm:$0xff] }
  0x15   : > { %1426 = vmatpush3.bf16.xpose.msra.mxu0 %v539_v19  ;;  %v542_v25 = vsel %vm531_vm0, %v482_v20, 0  ;;  %v483_v35 = vpack.c.bf16 %v450_v29, %v449_v28  ;;  %v492_v37 = vpack.c.bf16 %v468_v33, %v467_v32  ;;  %v452_v40 = vld [vmem:[%s1653_s22 + $0x38] sm:$0xff]  ;;  %v469_v44 = vld [vmem:[%s1653_s22 + $0xc0] sm:$0xff]  ;;  %v470_v45 = vld [vmem:[%s1653_s22 + $0xc8] sm:$0xff] }
  0x16   : > { %1446 = vmatprep.subr.msk.bf16.mxu0 %vm531_vm0, %v490_v14  ;;  %v484_v42 = vpack.c.bf16 %v452_v40, %v451_v39  ;;  %v493_v48 = vpack.c.bf16 %v470_v45, %v469_v44  ;;  %v453_v50 = vld [vmem:[%s1653_s22 + $0x40] sm:$0xff]  ;;  %v454_v51 = vld [vmem:[%s1653_s22 + $0x48] sm:$0xff]  ;;  %v471_v55 = vld [vmem:[%s1653_s22 + $0xd0] sm:$0xff] }
  0x17   : > { %790 = vperm.xlu0 %1463, %v782_v27   ;;  %v545_v36 = vsel %vm531_vm0, %v483_v35, 0  ;;  %v485_v53 = vpack.c.bf16 %v454_v51, %v453_v50  ;;  %v472_v56 = vld [vmem:[%s1653_s22 + $0xd8] sm:$0xff]  ;;  %v455_v61 = vld [vmem:[%s1653_s22 + $0x50] sm:$0xff]  ;;  %v473_v1 = vld [vmem:[%s1653_s22 + $0xe0] sm:$0xff] }
  0x18   : > { %868 = vperm.xlu1 %1464, %v862_v30   ;;  %v548_v47 = vsel %vm531_vm0, %v484_v42, 0  ;;  %v494_v59 = vpack.c.bf16 %v472_v56, %v471_v55  ;;  %v456_v62 = vld [vmem:[%s1653_s22 + $0x58] sm:$0xff]  ;;  %v474_v3 = vld [vmem:[%s1653_s22 + $0xe8] sm:$0xff]  ;;  %v457_v6 = vld [vmem:[%s1653_s22 + $0x60] sm:$0xff] }
  0x19   : > { %v551_v58 = vsel %vm531_vm0, %v485_v53, 0  ;;  %v486_v63 = vpack.c.bf16 %v456_v62, %v455_v61  ;;  %v495_v5 = vpack.c.bf16 %v474_v3, %v473_v1  ;;  %v458_v7 = vld [vmem:[%s1653_s22 + $0x68] sm:$0xff]  ;;  %v475_v9 = vld [vmem:[%s1653_s22 + $0xf0] sm:$0xff]  ;;  %v476_v10 = vld [vmem:[%s1653_s22 + $0xf8] sm:$0xff] }
  0x1a   : > { %v487_v8 = vpack.c.bf16 %v458_v7, %v457_v6  ;;  %v496_v12 = vpack.c.bf16 %v476_v10, %v475_v9  ;;  %v459_v13 = vld [vmem:[%s1653_s22 + $0x70] sm:$0xff]  ;;  %v460_v14 = vld [vmem:[%s1653_s22 + $0x78] sm:$0xff]  ;;  %v1466_v17 = vld [vmem:[%s1882_s1 + $0x8] sm:$0xff]  }
  0x1b   : > { %873 = vperm.xlu0 %1463, %v863_v31   ;;  %v554_v4 = vsel %vm531_vm0, %v486_v63, 0  ;;  %v488_v15 = vpack.c.bf16 %v460_v14, %v459_v13 }
  0x1c   : > { %878 = vperm.xlu1 %1464, %v864_v34   ;;  %v557_v11 = vsel %vm531_vm0, %v487_v8, 0 }
  0x1d   : > { %1428 = vmatpush3.bf16.xpose.msra.mxu0 %v542_v25  ;;  %v560_v16 = vsel %vm531_vm0, %v488_v15, 0 }
  0x1e   : > { %1447 = vmatprep.subr.msk.bf16.mxu0 %vm531_vm0, %v491_v26 }
  0x1f   : > { %883 = vperm.xlu0 %1463, %v865_v38  }
  0x20   : > { %985 = vperm.xlu1 %1464, %v975_v41  }
  0x23   : > { %990 = vperm.xlu0 %1463, %v976_v43  }
  0x24   : > { %995 = vperm.xlu1 %1464, %v977_v46  }
  0x25   : > { %1430 = vmatpush3.bf16.xpose.msra.mxu0 %v545_v36 }
  0x26   : > { %1448 = vmatprep.subr.msk.bf16.mxu0 %vm531_vm0, %v492_v37 }
  0x27   : > { %1000 = vperm.xlu0 %1463, %v978_v49   ;;  %v1467_v49 = vld [vmem:[%s1884_s3] sm:$0xff]  }
  0x28   : > { %1005 = vperm.xlu1 %1464, %v979_v52  }
  0x2b   : > { %1010 = vperm.xlu0 %1463, %v980_v54  }
  0x2c   : > { %1015 = vperm.xlu1 %1464, %v981_v57  }
  0x2d   : > { %1432 = vmatpush3.bf16.xpose.msra.mxu0 %v548_v47 }
  0x2e   : > { %1449 = vmatprep.subr.msk.bf16.mxu0 %vm531_vm0, %v493_v48 }
  0x2f   : > { %1020 = vperm.xlu0 %1463, %v982_v60  }
  0x35   : > { %1434 = vmatpush3.bf16.xpose.msra.mxu0 %v551_v58 }
  0x36   : > { %1450 = vmatprep.subr.msk.bf16.mxu0 %vm531_vm0, %v494_v59 }
  0x3d   : > { %1436 = vmatpush3.bf16.xpose.msra.mxu0 %v554_v4  ;;  %v721_v4 = vld [vmem:[%s1886_s5] sm:$0xf] }
  0x3e   : > { %1451 = vmatprep.subr.msk.bf16.mxu0 %vm531_vm0, %v495_v5 }
  0x45   : > { %1438 = vmatpush3.bf16.xpose.msra.mxu0 %v557_v11 }
  0x46   : > { %1452 = vmatprep.subr.msk.bf16.mxu0 %vm531_vm0, %v496_v12 }
  0x4d   : > { %1440 = vmatpush3.bf16.xpose.msra.mxu0 %v560_v16 }
  0x54   : > { %1442 = vmatmul.mubr.msk.bf16.vlgmr.msra.gmra.mrb[0].mxu0 %vm531_vm0, %v1629_v0 }
  0x55   : > { %1443 = vmatprep.mubr.msk.bf16.mxu0 %vm531_vm0, %v1466_v17 }
  0x5c   : > { %1444 = vmatmul.mubr.msk.bf16.gmra.mrb[4].mxu0 %vm531_vm0, %v1466_v17  ;;  %v1468_v17 = vld [vmem:[%s1888_s7] sm:$0xff]  }
  0x86   : > { %v504_v18 = vpop.permute.xlu0 %503 }
  0x87   : > { %v514_v27 = vpop.permute.xlu1 %513 }
  0x8a   : > { %v509_v22 = vpop.permute.xlu0 %508 }
  0x8b   : > { %v519_v37 = vpop.permute.xlu1 %518 }
  0x8e   : > { %v658_v50 = vpop.permute.xlu0 %657 }
  0x8f   : > { %v663_v54 = vpop.permute.xlu1 %662 }
  0x92   : > { %v728_v5 = vpop.permute.xlu0 %727 }
 0x127   : > { %v620_v19 = vpop.f32.mrb[0].mxu0 }
 0x128   : > { %v621_v20 = vadd.f32 %v620_v19, %v504_v18  ;;  %v622_v21 = vpop.f32.mrb[1].mxu0 }
 0x129   : > { %v623_v23 = vadd.f32 %v622_v21, %v504_v18  ;;  %v624_v24 = vpop.f32.mrb[2].mxu0  ;;  %v786_v18 = vpop.permute.xlu1 %785 }
 0x12a   : > { %v625_v25 = vadd.f32 %v624_v24, %v509_v22  ;;  %v626_v26 = vpop.f32.mrb[3].mxu0  ;;  %v639_v29 = vmax.f32 %v621_v20, 0.0 }
 0x12b   : > { %v627_v28 = vadd.f32 %v626_v26, %v509_v22  ;;  %v640_v31 = vmax.f32 %v623_v23, 0.0  ;;  %v791_v22 = vpop.permute.xlu0 %790 }
 0x12c   : > { %v641_v30 = vmax.f32 %v625_v25, 0.0 }
 0x12d   : > { %v642_v32 = vmax.f32 %v627_v28, 0.0 }
 0x12e   : > { %v649_v0 = vpack.c.bf16 %v641_v30, %v639_v29 }
 0x12f   : > { %v630_v33 = vpop.f32.mrb[4].mxu0  ;;  %v650_v34 = vpack.c.bf16 %v642_v32, %v640_v31 }
 0x130   : > { %v631_v35 = vadd.f32 %v630_v33, %v514_v27  ;;  %v632_v36 = vpop.f32.mrb[5].mxu0  ;;  %v1469_v33 = vld [vmem:[%s1890_s9] sm:$0xff]  }
 0x131   : > { %v633_v38 = vadd.f32 %v632_v36, %v514_v27  ;;  %v634_v39 = vpop.f32.mrb[6].mxu0  ;;  %674 = vmatprep.subr.bf16.mxu1 %v650_v34  ;;  %v1470_v34 = vld [vmem:[%s1890_s9 + $0x8] sm:$0xff]  }
 0x132   : > { %v635_v40 = vadd.f32 %v634_v39, %v519_v37  ;;  %v636_v41 = vpop.f32.mrb[7].mxu0  ;;  %675 = vmatpush1.bf16.msra.mxu1 %v649_v0  ;;  %v643_v43 = vmax.f32 %v631_v35, 0.0  ;;  %v869_v35 = vpop.permute.xlu1 %868 }
 0x133   : > { %v637_v42 = vadd.f32 %v636_v41, %v519_v37  ;;  %v644_v45 = vmax.f32 %v633_v38, 0.0  ;;  %v874_v39 = vpop.permute.xlu0 %873 }
 0x134   : > { %v645_v44 = vmax.f32 %v635_v40, 0.0 }
 0x135   : > { %v646_v46 = vmax.f32 %v637_v42, 0.0 }
 0x136   : > { %v651_v47 = vpack.c.bf16 %v645_v44, %v643_v43 }
 0x137   : > { %v652_v48 = vpack.c.bf16 %v646_v46, %v644_v45 }
 0x139   : > { %676 = vmatprep.subr.bf16.mxu1 %v652_v48 }
 0x13a   : > { %677 = vmatpush1.bf16.msra.mxu1 %v651_v47 }
 0x13d   : > { %1406 = vmatmul.mubr.msk.bf16.vlgmr.msra.gmra.mrb[0].mxu1 %vm670_vm1, %v1467_v49 }
 0x13e   : > { %766 = vmatprep.mubr.bf16.mxu1 %v1547_v2 }
 0x210   : > { %v708_v51 = vpop.f32.mrb[0].mxu1 }
 0x211   : > { %v709_v52 = vadd.f32 %v708_v51, %v658_v50  ;;  %v710_v53 = vpop.f32.mrb[1].mxu1 }
 0x212   : > { %v711_v55 = vadd.f32 %v710_v53, %v658_v50  ;;  %v712_v56 = vpop.f32.mrb[2].mxu1  ;;  %v879_v50 = vpop.permute.xlu1 %878 }
 0x213   : > { %v713_v57 = vadd.f32 %v712_v56, %v663_v54  ;;  %v714_v58 = vpop.f32.mrb[3].mxu1  ;;  %v717_v60 = vmax.f32 %v709_v52, 0.0 }
 0x214   : > { %v715_v59 = vadd.f32 %v714_v58, %v663_v54  ;;  %v718_v62 = vmax.f32 %v711_v55, 0.0  ;;  %v884_v55 = vpop.permute.xlu0 %883 }
 0x215   : > { %v719_v61 = vmax.f32 %v713_v57, 0.0 }
 0x216   : > { %v720_v63 = vmax.f32 %v715_v59, 0.0 }
 0x217   : > { %v722_v1 = vpack.c.bf16 %v719_v61, %v717_v60 }
 0x218   : > { %v723_v3 = vpack.c.bf16 %v720_v63, %v718_v62 }
 0x21a   : > { %734 = vmatprep.subr.bf16.mxu1 %v723_v3 }
 0x21b   : > { %735 = vmatpush1.bf16.msra.mxu1 %v722_v1 }
 0x21e   : > { %1407 = vmatmul.mubr.msk.bf16.vlgmr.msra.gmra.mrb[4].mxu1 %vm730_vm2, %v721_v4 }
 0x21f   : > { %841 = vmatprep.mubr.bf16.mxu1 %v1547_v2 }
 0x2f1   : > { %v768_v6 = vpop.f32.mrb[4].mxu1 }
 0x2f2   : > { %v769_v7 = vadd.f32 %v768_v6, %v728_v5  ;;  %v770_v8 = vpop.f32.mrb[5].mxu1  ;;  %v1472_v6 = vld [vmem:[%s1892_s11 + $0x8] sm:$0xff]  }
 0x2f3   : > { %v771_v9 = vadd.f32 %v770_v8, %v728_v5  ;;  %v772_v10 = vpop.f32.mrb[6].mxu1  ;;  %v1471_v5 = vld [vmem:[%s1892_s11] sm:$0xff]   ;;  %v1474_v8 = vld [vmem:[%s1892_s11 + $0x18] sm:$0xff]  }
 0x2f4   : > { %v775_v11 = vmax.f32 %v769_v7, 0.0  ;;  %v773_v12 = vpop.f32.mrb[7].mxu1  ;;  %v1473_v7 = vld [vmem:[%s1892_s11 + $0x10] sm:$0xff]  }
 0x2f5   : > { %v776_v13 = vmax.f32 %v771_v9, 0.0  ;;  %v986_v9 = vpop.permute.xlu1 %985 }
 0x2f6   : > { %v779_v14 = vpack.c.bf16 %v775_v11, %v775_v11 }
 0x2f7   : > { %v780_v15 = vpack.c.bf16 %v776_v13, %v776_v13  ;;  %v991_v13 = vpop.permute.xlu0 %990 }
 0x2f8   : > { %v804_v16 = vsel %vm802_vm3, %v779_v14, 0 }
 0x2f9   : > { %1409 = vmatprep.subr.msk.bf16.mxu1 %vm802_vm3, %v780_v15 }
 0x2fa   : > { %810 = vmatpush1.bf16.msra.mxu1 %v804_v16 }
 0x2fd   : > { %1410 = vmatmul.mubr.msk.bf16.vlgmr.msra.gmra.mrb[8].mxu1 %vm798_vm4, %v1468_v17 }
 0x2fe   : > { %934 = vmatprep.mubr.bf16.mxu1 %v1547_v2 }
 0x3d0   : > { %v843_v19 = vpop.f32.mrb[8].mxu1 }
 0x3d1   : > { %v844_v20 = vadd.f32 %v843_v19, %v786_v18  ;;  %v845_v21 = vpop.f32.mrb[9].mxu1 }
 0x3d2   : > { %v846_v23 = vadd.f32 %v845_v21, %v786_v18  ;;  %v847_v24 = vpop.f32.mrb[10].mxu1 }
 0x3d3   : > { %v848_v25 = vadd.f32 %v847_v24, %v791_v22  ;;  %v849_v26 = vpop.f32.mrb[11].mxu1  ;;  %v852_v28 = vmax.f32 %v844_v20, 0.0 }
 0x3d4   : > { %v850_v27 = vadd.f32 %v849_v26, %v791_v22  ;;  %v853_v30 = vmax.f32 %v846_v23, 0.0  ;;  %v996_v26 = vpop.permute.xlu1 %995 }
 0x3d5   : > { %v854_v29 = vmax.f32 %v848_v25, 0.0 }
 0x3d6   : > { %v855_v31 = vmax.f32 %v850_v27, 0.0 }
 0x3d7   : > { %v860_v32 = vpack.c.bf16 %v854_v29, %v852_v28 }
 0x3d8   : > { %v861_v0 = vpack.c.bf16 %v855_v31, %v853_v30 }
 0x3da   : > { %902 = vmatprep.subr.bf16.mxu1 %v861_v0  ;;  %v1001_v0 = vpop.permute.xlu0 %1000 }
 0x3db   : > { %903 = vmatpush1.bf16.msra.mxu1 %v860_v32 }
 0x3de   : > { %1413 = vmatmul.mubr.msk.bf16.vlgmr.msra.gmra.mrb[12].mxu1 %vm730_vm2, %v1469_v33 }
 0x3df   : > { %944 = vmatprep.mubr.bf16.mxu1 %v1547_v2 }
 0x3e6   : > { %1414 = vmatmul.mubr.msk.bf16.gmra.mrb[16].mxu1 %vm730_vm2, %v1470_v34 }
 0x3e7   : > { %1087 = vmatprep.mubr.bf16.mxu1 %v1547_v2 }
 0x4b1   : > { %v936_v36 = vpop.f32.mrb[12].mxu1 }
 0x4b2   : > { %v937_v37 = vadd.f32 %v936_v36, %v869_v35  ;;  %v938_v38 = vpop.f32.mrb[13].mxu1 }
 0x4b3   : > { %v939_v40 = vadd.f32 %v938_v38, %v869_v35  ;;  %v940_v41 = vpop.f32.mrb[14].mxu1 }
 0x4b4   : > { %v941_v42 = vadd.f32 %v940_v41, %v874_v39  ;;  %v942_v43 = vpop.f32.mrb[15].mxu1  ;;  %v955_v45 = vmax.f32 %v937_v37, 0.0 }
 0x4b5   : > { %v943_v44 = vadd.f32 %v942_v43, %v874_v39  ;;  %v956_v47 = vmax.f32 %v939_v40, 0.0 }
 0x4b6   : > { %v957_v46 = vmax.f32 %v941_v42, 0.0 }
 0x4b7   : > { %v958_v48 = vmax.f32 %v943_v44, 0.0 }
 0x4b8   : > { %v971_v49 = vpack.c.bf16 %v957_v46, %v955_v45 }
 0x4b9   : > { %v972_v51 = vpack.c.bf16 %v958_v48, %v956_v47  ;;  %v946_v52 = vpop.f32.mrb[16].mxu1  ;;  %v1006_v47 = vpop.permute.xlu1 %1005 }
 0x4ba   : > { %v947_v53 = vadd.f32 %v946_v52, %v879_v50  ;;  %v948_v54 = vpop.f32.mrb[17].mxu1 }
 0x4bb   : > { %v949_v56 = vadd.f32 %v948_v54, %v879_v50  ;;  %v950_v57 = vpop.f32.mrb[18].mxu1  ;;  %1055 = vmatprep.subr.bf16.mxu1 %v972_v51  ;;  %v1011_v54 = vpop.permute.xlu0 %1010 }
 0x4bc   : > { %v951_v58 = vadd.f32 %v950_v57, %v884_v55  ;;  %v952_v59 = vpop.f32.mrb[19].mxu1  ;;  %1056 = vmatpush1.bf16.msra.mxu1 %v971_v49  ;;  %v959_v61 = vmax.f32 %v947_v53, 0.0 }
 0x4bd   : > { %v953_v60 = vadd.f32 %v952_v59, %v884_v55  ;;  %v960_v63 = vmax.f32 %v949_v56, 0.0 }
 0x4be   : > { %v961_v62 = vmax.f32 %v951_v58, 0.0 }
 0x4bf   : > { %v962_v1 = vmax.f32 %v953_v60, 0.0 }
 0x4c0   : > { %v973_v3 = vpack.c.bf16 %v961_v62, %v959_v61 }
 0x4c1   : > { %v974_v4 = vpack.c.bf16 %v962_v1, %v960_v63 }
 0x4c3   : > { %1057 = vmatprep.subr.bf16.mxu1 %v974_v4 }
 0x4c4   : > { %1058 = vmatpush1.bf16.msra.mxu1 %v973_v3 }
 0x4c7   : > { %1419 = vmatmul.mubr.msk.bf16.vlgmr.msra.gmra.mrb[20].mxu1 %vm670_vm1, %v1471_v5 }
 0x4c8   : > { %1097 = vmatprep.mubr.bf16.mxu1 %v1547_v2 }
 0x4cf   : > { %1420 = vmatmul.mubr.msk.bf16.gmra.mrb[24].mxu1 %vm670_vm1, %v1472_v6 }
 0x4d0   : > { %1107 = vmatprep.mubr.bf16.mxu1 %v1547_v2 }
 0x4d7   : > { %1421 = vmatmul.mubr.msk.bf16.gmra.mrb[28].mxu1 %vm670_vm1, %v1473_v7 }
 0x4d8   : > { %1117 = vmatprep.mubr.bf16.mxu1 %v1547_v2 }
 0x4df   : > { %1422 = vmatmul.mubr.msk.bf16.gmra.mrb[32].mxu1 %vm670_vm1, %v1474_v8 }
 0x59a   : > { %v1089_v10 = vpop.f32.mrb[20].mxu1 }
 0x59b   : > { %v1090_v11 = vadd.f32 %v1089_v10, %v986_v9  ;;  %v1091_v12 = vpop.f32.mrb[21].mxu1 }
 0x59c   : > { %v1092_v14 = vadd.f32 %v1091_v12, %v986_v9  ;;  %v1093_v15 = vpop.f32.mrb[22].mxu1 }
 0x59d   : > { %v1128_v16 = vmax.f32 %v1090_v11, 0.0  ;;  %v1094_v17 = vadd.f32 %v1093_v15, %v991_v13  ;;  %v1095_v18 = vpop.f32.mrb[23].mxu1  ;;  %v1016_v15 = vpop.permute.xlu1 %1015 }
 0x59e   : > { %v1129_v19 = vmax.f32 %v1092_v14, 0.0  ;;  %v1096_v20 = vadd.f32 %v1095_v18, %v991_v13 }
 0x59f   : > { %v1144_v21 = vsub.f32 0.0, %v1128_v16  ;;  %v1130_v2 = vmax.f32 %v1094_v17, 0.0 }
 0x5a0   : > { %v1145_v22 = vsub.f32 0.0, %v1129_v19  ;;  %v1131_v23 = vmax.f32 %v1096_v20, 0.0 }
 0x5a1   : > { %v1160_v24 = vmul.f32 1.442695, %v1144_v21  ;;  %v1146_v25 = vsub.f32 0.0, %v1130_v2  ;;  %v1021_v2 = vpop.permute.xlu0 %1020 }
 0x5a2   : > { %v1162_v27 = vmul.f32 1.442695, %v1145_v22  ;;  %v1147_v28 = vsub.f32 0.0, %v1131_v23  ;;  %v1099_v29 = vpop.f32.mrb[24].mxu1 }
 0x5a3   : > { %1475 = vpow2.f32 %v1160_v24  ;;  %v1164_v30 = vmul.f32 1.442695, %v1146_v25  ;;  %v1100_v31 = vadd.f32 %v1099_v29, %v996_v26  ;;  %v1101_v32 = vpop.f32.mrb[25].mxu1 }
 0x5a4   : > { %1477 = vpow2.f32 %v1162_v27  ;;  %v1166_v33 = vmul.f32 1.442695, %v1147_v28  ;;  %v1102_v34 = vadd.f32 %v1101_v32, %v996_v26  ;;  %v1103_v35 = vpop.f32.mrb[26].mxu1 }
 0x5a5   : > { %1479 = vpow2.f32 %v1164_v30  ;;  %v1132_v36 = vmax.f32 %v1100_v31, 0.0  ;;  %v1104_v37 = vadd.f32 %v1103_v35, %v1001_v0  ;;  %v1105_v38 = vpop.f32.mrb[27].mxu1 }
 0x5a6   : > { %1481 = vpow2.f32 %v1166_v33  ;;  %v1133_v39 = vmax.f32 %v1102_v34, 0.0  ;;  %v1106_v40 = vadd.f32 %v1105_v38, %v1001_v0 }
 0x5a7   : > { %v1148_v41 = vsub.f32 0.0, %v1132_v36  ;;  %v1134_v42 = vmax.f32 %v1104_v37, 0.0 }
 0x5a8   : > { %v1149_v43 = vsub.f32 0.0, %v1133_v39  ;;  %v1135_v44 = vmax.f32 %v1106_v40, 0.0 }
 0x5a9   : > { %v1168_v45 = vmul.f32 1.442695, %v1148_v41  ;;  %v1150_v46 = vsub.f32 0.0, %v1134_v42 }
 0x5aa   : > { %v1170_v48 = vmul.f32 1.442695, %v1149_v43  ;;  %v1151_v49 = vsub.f32 0.0, %v1135_v44  ;;  %v1109_v50 = vpop.f32.mrb[28].mxu1 }
 0x5ab   : > { %1483 = vpow2.f32 %v1168_v45  ;;  %v1172_v51 = vmul.f32 1.442695, %v1150_v46  ;;  %v1110_v52 = vadd.f32 %v1109_v50, %v1006_v47  ;;  %v1111_v53 = vpop.f32.mrb[29].mxu1 }
 0x5ac   : > { %1485 = vpow2.f32 %v1170_v48  ;;  %v1174_v55 = vmul.f32 1.442695, %v1151_v49  ;;  %v1112_v56 = vadd.f32 %v1111_v53, %v1006_v47  ;;  %v1113_v57 = vpop.f32.mrb[30].mxu1 }
 0x5ad   : > { %v1476_v58 = vpop.eup %1475  ;;  %1487 = vpow2.f32 %v1172_v51  ;;  %v1136_v59 = vmax.f32 %v1110_v52, 0.0  ;;  %v1114_v60 = vadd.f32 %v1113_v57, %v1011_v54  ;;  %v1115_v61 = vpop.f32.mrb[31].mxu1 }
 0x5ae   : > { %v1478_v62 = vpop.eup %1477  ;;  %v1192_v63 = vadd.f32 1.0, %v1476_v58  ;;  %1489 = vpow2.f32 %v1174_v55  ;;  %v1137_v1 = vmax.f32 %v1112_v56, 0.0  ;;  %v1116_v3 = vadd.f32 %v1115_v61, %v1011_v54 }
 0x5af   : > { %v1480_v4 = vpop.eup %1479  ;;  %v1193_v5 = vadd.f32 1.0, %v1478_v62  ;;  %v1152_v6 = vsub.f32 0.0, %v1136_v59  ;;  %v1138_v7 = vmax.f32 %v1114_v60, 0.0 }
 0x5b0   : > { %v1482_v8 = vpop.eup %1481  ;;  %1491 = vrcp.f32 %v1192_v63  ;;  %v1194_v9 = vadd.f32 1.0, %v1480_v4  ;;  %v1153_v10 = vsub.f32 0.0, %v1137_v1  ;;  %v1139_v11 = vmax.f32 %v1116_v3, 0.0 }
 0x5b1   : > { %1493 = vrcp.f32 %v1193_v5  ;;  %v1195_v12 = vadd.f32 1.0, %v1482_v8  ;;  %v1176_v13 = vmul.f32 1.442695, %v1152_v6  ;;  %v1154_v14 = vsub.f32 0.0, %v1138_v7 }
 0x5b2   : > { %1495 = vrcp.f32 %v1194_v9  ;;  %v1178_v16 = vmul.f32 1.442695, %v1153_v10  ;;  %v1155_v17 = vsub.f32 0.0, %v1139_v11  ;;  %v1119_v18 = vpop.f32.mrb[32].mxu1 }
 0x5b3   : > { %1497 = vrcp.f32 %v1195_v12  ;;  %v1180_v19 = vmul.f32 1.442695, %v1154_v14  ;;  %v1120_v20 = vadd.f32 %v1119_v18, %v1016_v15  ;;  %v1121_v21 = vpop.f32.mrb[33].mxu1 }
 0x5b4   : > { %1499 = vpow2.f32 %v1176_v13  ;;  %v1182_v22 = vmul.f32 1.442695, %v1155_v17  ;;  %v1122_v23 = vadd.f32 %v1121_v21, %v1016_v15  ;;  %v1123_v24 = vpop.f32.mrb[34].mxu1 }
 0x5b5   : > { %v1484_v25 = vpop.eup %1483  ;;  %1501 = vpow2.f32 %v1178_v16  ;;  %v1140_v26 = vmax.f32 %v1120_v20, 0.0  ;;  %v1124_v27 = vadd.f32 %v1123_v24, %v1021_v2  ;;  %v1125_v28 = vpop.f32.mrb[35].mxu1 }
 0x5b6   : > { %v1486_v29 = vpop.eup %1485  ;;  %v1196_v30 = vadd.f32 1.0, %v1484_v25  ;;  %1503 = vpow2.f32 %v1180_v19  ;;  %v1141_v31 = vmax.f32 %v1122_v23, 0.0  ;;  %v1126_v32 = vadd.f32 %v1125_v28, %v1021_v2 }
 0x5b7   : > { %v1488_v0 = vpop.eup %1487  ;;  %v1197_v33 = vadd.f32 1.0, %v1486_v29  ;;  %1505 = vpow2.f32 %v1182_v22  ;;  %v1156_v34 = vsub.f32 0.0, %v1140_v26  ;;  %v1142_v35 = vmax.f32 %v1124_v27, 0.0 }
 0x5b8   : > { %v1490_v36 = vpop.eup %1489  ;;  %1507 = vrcp.f32 %v1196_v30  ;;  %v1198_v37 = vadd.f32 1.0, %v1488_v0  ;;  %v1157_v38 = vsub.f32 0.0, %v1141_v31  ;;  %v1143_v39 = vmax.f32 %v1126_v32, 0.0 }
 0x5b9   : > { %1509 = vrcp.f32 %v1197_v33  ;;  %v1199_v40 = vadd.f32 1.0, %v1490_v36  ;;  %v1184_v41 = vmul.f32 1.442695, %v1156_v34  ;;  %v1158_v42 = vsub.f32 0.0, %v1142_v35 }
 0x5ba   : > { %v1492_v43 = vpop.eup %1491  ;;  %1511 = vrcp.f32 %v1198_v37  ;;  %v1186_v44 = vmul.f32 1.442695, %v1157_v38  ;;  %v1159_v45 = vsub.f32 0.0, %v1143_v39 }
 0x5bb   : > { %v1494_v46 = vpop.eup %1493  ;;  %1513 = vrcp.f32 %v1199_v40  ;;  %v1188_v47 = vmul.f32 1.442695, %v1158_v42  ;;  %1240 = vxpose.xlu1.b32.start [1/8] (short) %v1492_v43, 128 }
 0x5bc   : > { %v1496_v48 = vpop.eup %1495  ;;  %1515 = vpow2.f32 %v1184_v41  ;;  %v1190_v49 = vmul.f32 1.442695, %v1159_v45  ;;  %1272 = vxpose.xlu0.b32.start [1/8] (short) %v1494_v46, 128 }
 0x5bd   : > { %v1498_v50 = vpop.eup %1497  ;;  %1517 = vpow2.f32 %v1186_v44 }
 0x5be   : > { %v1500_v51 = vpop.eup %1499  ;;  %1519 = vpow2.f32 %v1188_v47 }
 0x5bf   : > { %v1502_v52 = vpop.eup %1501  ;;  %v1200_v53 = vadd.f32 1.0, %v1500_v51  ;;  %1521 = vpow2.f32 %v1190_v49  ;;  %1241 = vxpose.xlu1.b32.cont [2/8] (short) %v1496_v48, 128 }
 0x5c0   : > { %v1504_v54 = vpop.eup %1503  ;;  %v1201_v55 = vadd.f32 1.0, %v1502_v52  ;;  %1273 = vxpose.xlu0.b32.cont [2/8] (short) %v1498_v50, 128 }
 0x5c1   : > { %v1506_v56 = vpop.eup %1505  ;;  %1523 = vrcp.f32 %v1200_v53  ;;  %v1202_v57 = vadd.f32 1.0, %v1504_v54 }
 0x5c2   : > { %v1508_v58 = vpop.eup %1507  ;;  %1525 = vrcp.f32 %v1201_v55  ;;  %v1203_v59 = vadd.f32 1.0, %v1506_v56 }
 0x5c3   : > { %v1510_v60 = vpop.eup %1509  ;;  %1242 = vxpose.xlu1.b32.cont [3/8] (short) %v1508_v58, 128  ;;  %1527 = vrcp.f32 %v1202_v57 }
 0x5c4   : > { %v1512_v61 = vpop.eup %1511  ;;  %1274 = vxpose.xlu0.b32.cont [3/8] (short) %v1510_v60, 128  ;;  %1529 = vrcp.f32 %v1203_v59 }
 0x5c5   : > { %v1514_v62 = vpop.eup %1513 }
 0x5c6   : > { %v1516_v63 = vpop.eup %1515 }
 0x5c7   : > { %v1518_v1 = vpop.eup %1517  ;;  %v1204_v3 = vadd.f32 1.0, %v1516_v63  ;;  %1243 = vxpose.xlu1.b32.cont [4/8] (short) %v1512_v61, 128 }
 0x5c8   : > { %v1520_v4 = vpop.eup %1519  ;;  %v1205_v5 = vadd.f32 1.0, %v1518_v1  ;;  %1275 = vxpose.xlu0.b32.cont [4/8] (short) %v1514_v62, 128 }
 0x5c9   : > { %v1522_v6 = vpop.eup %1521  ;;  %1531 = vrcp.f32 %v1204_v3  ;;  %v1206_v7 = vadd.f32 1.0, %v1520_v4 }
 0x5ca   : > { %1533 = vrcp.f32 %v1205_v5  ;;  %v1207_v8 = vadd.f32 1.0, %v1522_v6 }
 0x5cb   : > { %v1524_v9 = vpop.eup %1523  ;;  %1535 = vrcp.f32 %v1206_v7 }
 0x5cc   : > { %v1526_v10 = vpop.eup %1525  ;;  %1244 = vxpose.xlu1.b32.cont [5/8] (short) %v1524_v9, 128  ;;  %1537 = vrcp.f32 %v1207_v8 }
 0x5cd   : > { %1276 = vxpose.xlu0.b32.cont [5/8] (short) %v1526_v10, 128  ;;  %v1528_v11 = vpop.eup %1527 }
 0x5ce   : > { %v1530_v12 = vpop.eup %1529 }
 0x5d0   : > { %1245 = vxpose.xlu1.b32.cont [6/8] (short) %v1528_v11, 128 }
 0x5d1   : > { %1277 = vxpose.xlu0.b32.cont [6/8] (short) %v1530_v12, 128 }
 0x5d3   : > { %v1532_v13 = vpop.eup %1531 }
 0x5d4   : > { %v1534_v14 = vpop.eup %1533  ;;  %1246 = vxpose.xlu1.b32.cont [7/8] (short) %v1532_v13, 128 }
 0x5d5   : > { %1278 = vxpose.xlu0.b32.cont [7/8] (short) %v1534_v14, 128  ;;  %v1536_v15 = vpop.eup %1535 }
 0x5d6   : > { %v1538_v16 = vpop.eup %1537 }
 0x5d8   : > { %1247 = vxpose.xlu1.b32.end [8/8] (short) %v1536_v15, 128 }
 0x5d9   : > { %1279 = vxpose.xlu0.b32.end [8/8] (short) %v1538_v16, 128 }
 0x63c   : > { %v1256_v17 = vpop.trf.xlu1 }
 0x63d   : > { %v1288_v18 = vpop.trf.xlu0  ;;  %1304 = vst.msk [vmem:[%s1812_s29] sm:$0xff] %vm531_vm0, %v1256_v17 }
 0x63e   : > { %1320 = vst.msk [vmem:[%s1812_s29 + $0x80] sm:$0xff] %vm531_vm0, %v1288_v18 }
 0x640   : > { %v1257_v19 = vpop.trf.xlu1 }
 0x641   : > { %v1289_v20 = vpop.trf.xlu0  ;;  %1305 = vst.msk [vmem:[%s1812_s29 + $0x8] sm:$0xff] %vm531_vm0, %v1257_v19 }
 0x642   : > { %1321 = vst.msk [vmem:[%s1812_s29 + $0x88] sm:$0xff] %vm531_vm0, %v1289_v20 }
 0x644   : > { %v1258_v21 = vpop.trf.xlu1 }
 0x645   : > { %v1290_v2 = vpop.trf.xlu0  ;;  %1306 = vst.msk [vmem:[%s1812_s29 + $0x10] sm:$0xff] %vm531_vm0, %v1258_v21 }
 0x646   : > { %1322 = vst.msk [vmem:[%s1812_s29 + $0x90] sm:$0xff] %vm531_vm0, %v1290_v2 }
 0x648   : > { %v1259_v22 = vpop.trf.xlu1 }
 0x649   : > { %v1291_v23 = vpop.trf.xlu0  ;;  %1307 = vst.msk [vmem:[%s1812_s29 + $0x18] sm:$0xff] %vm531_vm0, %v1259_v22 }
 0x64a   : > { %1323 = vst.msk [vmem:[%s1812_s29 + $0x98] sm:$0xff] %vm531_vm0, %v1291_v23 }
 0x64c   : > { %v1260_v24 = vpop.trf.xlu1 }
 0x64d   : > { %v1292_v25 = vpop.trf.xlu0  ;;  %1308 = vst.msk [vmem:[%s1812_s29 + $0x20] sm:$0xff] %vm531_vm0, %v1260_v24 }
 0x64e   : > { %1324 = vst.msk [vmem:[%s1812_s29 + $0xa0] sm:$0xff] %vm531_vm0, %v1292_v25 }
 0x650   : > { %v1261_v26 = vpop.trf.xlu1 }
 0x651   : > { %v1293_v27 = vpop.trf.xlu0  ;;  %1309 = vst.msk [vmem:[%s1812_s29 + $0x28] sm:$0xff] %vm531_vm0, %v1261_v26 }
 0x652   : > { %1325 = vst.msk [vmem:[%s1812_s29 + $0xa8] sm:$0xff] %vm531_vm0, %v1293_v27 }
 0x654   : > { %v1262_v28 = vpop.trf.xlu1 }
 0x655   : > { %v1294_v29 = vpop.trf.xlu0  ;;  %1310 = vst.msk [vmem:[%s1812_s29 + $0x30] sm:$0xff] %vm531_vm0, %v1262_v28 }
 0x656   : > { %1326 = vst.msk [vmem:[%s1812_s29 + $0xb0] sm:$0xff] %vm531_vm0, %v1294_v29 }
 0x658   : > { %v1263_v30 = vpop.trf.xlu1 }
 0x659   : > { %v1295_v31 = vpop.trf.xlu0  ;;  %1311 = vst.msk [vmem:[%s1812_s29 + $0x38] sm:$0xff] %vm531_vm0, %v1263_v30 }
 0x65a   : > { %1327 = vst.msk [vmem:[%s1812_s29 + $0xb8] sm:$0xff] %vm531_vm0, %v1295_v31 }
 0x65c   : > { %v1264_v32 = vpop.trf.xlu1 }
 0x65d   : > { %v1296_v0 = vpop.trf.xlu0  ;;  %1312 = vst.msk [vmem:[%s1812_s29 + $0x40] sm:$0xff] %vm531_vm0, %v1264_v32 }
 0x65e   : > { %1328 = vst.msk [vmem:[%s1812_s29 + $0xc0] sm:$0xff] %vm531_vm0, %v1296_v0 }
 0x660   : > { %v1265_v33 = vpop.trf.xlu1 }
 0x661   : > { %v1297_v34 = vpop.trf.xlu0  ;;  %1313 = vst.msk [vmem:[%s1812_s29 + $0x48] sm:$0xff] %vm531_vm0, %v1265_v33 }
 0x662   : > { %1329 = vst.msk [vmem:[%s1812_s29 + $0xc8] sm:$0xff] %vm531_vm0, %v1297_v34 }
 0x664   : > { %v1266_v35 = vpop.trf.xlu1 }
 0x665   : > { %v1298_v36 = vpop.trf.xlu0  ;;  %1314 = vst.msk [vmem:[%s1812_s29 + $0x50] sm:$0xff] %vm531_vm0, %v1266_v35 }
 0x666   : > { %1330 = vst.msk [vmem:[%s1812_s29 + $0xd0] sm:$0xff] %vm531_vm0, %v1298_v36 }
 0x668   : > { %v1267_v37 = vpop.trf.xlu1 }
 0x669   : > { %v1299_v38 = vpop.trf.xlu0  ;;  %1315 = vst.msk [vmem:[%s1812_s29 + $0x58] sm:$0xff] %vm531_vm0, %v1267_v37 }
 0x66a   : > { %1331 = vst.msk [vmem:[%s1812_s29 + $0xd8] sm:$0xff] %vm531_vm0, %v1299_v38 }
 0x66c   : > { %v1268_v39 = vpop.trf.xlu1 }
 0x66d   : > { %v1300_v40 = vpop.trf.xlu0  ;;  %1316 = vst.msk [vmem:[%s1812_s29 + $0x60] sm:$0xff] %vm531_vm0, %v1268_v39 }
 0x66e   : > { %1332 = vst.msk [vmem:[%s1812_s29 + $0xe0] sm:$0xff] %vm531_vm0, %v1300_v40 }
 0x670   : > { %v1269_v41 = vpop.trf.xlu1 }
 0x671   : > { %v1301_v42 = vpop.trf.xlu0  ;;  %1317 = vst.msk [vmem:[%s1812_s29 + $0x68] sm:$0xff] %vm531_vm0, %v1269_v41 }
 0x672   : > { %1333 = vst.msk [vmem:[%s1812_s29 + $0xe8] sm:$0xff] %vm531_vm0, %v1301_v42 }
 0x674   : > { %v1270_v43 = vpop.trf.xlu1 }
 0x675   : > { %v1302_v44 = vpop.trf.xlu0  ;;  %1318 = vst.msk [vmem:[%s1812_s29 + $0x70] sm:$0xff] %vm531_vm0, %v1270_v43 }
 0x676   : > { %1334 = vst.msk [vmem:[%s1812_s29 + $0xf0] sm:$0xff] %vm531_vm0, %v1302_v44 }
 0x678   : > { %v1271_v45 = vpop.trf.xlu1 }
 0x679   : > { %v1303_v46 = vpop.trf.xlu0  ;;  %1319 = vst.msk [vmem:[%s1812_s29 + $0x78] sm:$0xff] %vm531_vm0, %v1271_v45 }
 0x67a   : > { %1335 = vst.msk [vmem:[%s1812_s29 + $0xf8] sm:$0xff] %vm531_vm0, %v1303_v46 }
 0x67b PF: > { %s23_s25 = sadd.s32 1, %s1545_s25  }
 0x67c   : > { %p20_p4 = scmp.ge.s32.totalorder %s23_s25, 6  }
 0x67e   :  { %22 = sbr.rel (!%p20_p4) target bundleno = 1 (0x1), region = 102 }

</bundles_post_ra>
